<compile_context>
chip_gen: v7x
topology: tpu7x:2x2x1
jax: 0.10.0
libtpu: 0.0.40
codegen_flags: <defaults>
</compile_context>

<pallas_src>
import jax
import jax.numpy as jnp
from jax import lax
from jax.experimental import pallas as pl
from jax.experimental.pallas import tpu as pltpu

EPS = 1e-12  # torch.nn.functional.normalize default eps


def _round_up(a: int, b: int) -> int:
    return (a + b - 1) // b * b


def _l2_normalize_kernel(x_ref, o_ref):
    # x_ref / o_ref block shape: (1, C, T_HW); reduction over the channel axis.
    x = x_ref[...]
    xf = x.astype(jnp.float32)
    ssq = jnp.sum(xf * xf, axis=1, keepdims=True)          # (1, 1, T_HW) f32
    # clamp the sum of squares with EPS^2 == clamp of the norm with EPS
    inv = lax.rsqrt(jnp.maximum(ssq, EPS * EPS))            # EUP rsqrt
    if o_ref.dtype == jnp.float32:
        o_ref[...] = xf * inv
    else:
        # keep the big elementwise multiply in the native (narrow) dtype
        o_ref[...] = x * inv.astype(x.dtype)


def _choose_tile_hw(C: int, HW: int) -> int:
    """Largest multiple-of-128 spatial tile that keeps 4 double-buffered
    blocks comfortably inside every generation's VMEM budget."""
    # Total budget for 2 input + 2 output block buffers. 12 MiB fits v5e's
    # 16 MiB default scoped VMEM with headroom; bump modestly if the chip
    # reports more physical VMEM (never above 32 MiB -> safe on v7x's 64 MiB).
    budget = 12 * 1024 * 1024
    try:
        vmem = int(getattr(pltpu.get_tpu_info(), "vmem_capacity_bytes", 0))
        if vmem > 0:
            budget = min(max(budget, vmem // 8), 32 * 1024 * 1024)
    except Exception:
        pass

    c_pad = _round_up(C, 8)                # sublane padding (conservative 32b rows)
    per_block = budget // 4                # 2 in + 2 out buffers
    t = per_block // (c_pad * 4)
    t = max(128, (t // 128) * 128)         # lane-dense, multiple of 128
    t = min(t, 4096)                       # diminishing returns past this
    t = min(t, _round_up(HW, 128))         # don't overshoot small feature maps
    return t


def normalize(x, p=2):
    """F.normalize(x, p=2, dim=1) for NCHW input via a Pallas TPU kernel."""
    assert p == 2, "only p=2 implemented (matches module default)"
    N, C, H, W = x.shape
    HW = H * W
    itemsize = jnp.dtype(x.dtype).itemsize

    t_hw = _choose_tile_hw(C, HW)
    hw_padded = _round_up(HW, t_hw)
    n_hw = hw_padded // t_hw

    x_flat = x.reshape(N, C, HW)
    if hw_padded != HW:
        # zero padding: each padded column normalizes independently to 0
        x_flat = jnp.pad(x_flat, ((0, 0), (0, 0), (0, hw_padded - HW)))

    cost = pl.CostEstimate(
        flops=3 * N * C * HW,
        transcendentals=N * HW,
        bytes_accessed=2 * N * C * HW * itemsize,
    )

    out_flat = pl.pallas_call(
        _l2_normalize_kernel,
        out_shape=jax.ShapeDtypeStruct((N, C, hw_padded), x.dtype),
        grid_spec=pltpu.PrefetchScalarGridSpec(
            num_scalar_prefetch=0,
            grid=(N, n_hw),
            in_specs=[pl.BlockSpec((1, C, t_hw), lambda n, s: (n, 0, s))],
            out_specs=pl.BlockSpec((1, C, t_hw), lambda n, s: (n, 0, s)),
        ),
        compiler_params=pltpu.CompilerParams(
            dimension_semantics=("parallel", "parallel"),
            vmem_limit_bytes=32 * 1024 * 1024,
        ),
        cost_estimate=cost,
    )(x_flat)

    if hw_padded != HW:
        out_flat = out_flat[:, :, :HW]
    return out_flat.reshape(N, C, H, W)


if __name__ == "__main__":
    key = jax.random.PRNGKey(0)
    # small NCHW conv-style feature map
    x = jax.random.normal(key, (2, 4, 16, 16), dtype=jnp.float32)

    out = normalize(x, p=2)
    out = jax.block_until_ready(out)

    # reference check (plain JAX), mirrors torch.nn.functional.normalize
    norm = jnp.sqrt(jnp.sum(x * x, axis=1, keepdims=True))
    ref = x / jnp.maximum(norm, EPS)
    assert out.shape == x.shape and out.dtype == x.dtype
    assert jnp.allclose(out, ref, atol=1e-5, rtol=1e-5)

    print("KERNEL_OK")
</pallas_src>

<mosaic_0001>
module attributes {stable_mosaic.version = 11 : i64} {
  func.func @_l2_normalize_kernel(%arg0: i32, %arg1: i32, %arg2: memref<1x4x256xf32, #tpu.memory_space<vmem>>, %arg3: memref<1x4x256xf32, #tpu.memory_space<vmem>>) attributes {dimension_semantics = [#tpu.dimension_semantics<parallel>, #tpu.dimension_semantics<parallel>], iteration_bounds = array<i64: 2, 1>, scalar_prefetch = 0 : i64, scratch_operands = 0 : i64, tpu.core_type = #tpu.core_type<tc>, window_params = [{transform_indices = @transform_0, window_bounds = array<i64: 1, 4, 256>}, {transform_indices = @transform_1, window_bounds = array<i64: 1, 4, 256>}]} {
    %c0 = arith.constant 0 : index
    %c0_0 = arith.constant 0 : index
    %c0_1 = arith.constant 0 : index
    %0 = vector.load %arg2[%c0, %c0_0, %c0_1] : memref<1x4x256xf32, #tpu.memory_space<vmem>>, vector<1x4x256xf32>
    %1 = arith.mulf %0, %0 : vector<1x4x256xf32>
    %cst = arith.constant dense<0.000000e+00> : vector<1x256xf32>
    %2 = vector.multi_reduction <add>, %1, %cst [1] : vector<1x4x256xf32> to vector<1x256xf32>
    %3 = vector.shape_cast %2 : vector<1x256xf32> to vector<1x1x256xf32>
    %cst_2 = arith.constant 1.000000e-24 : f32
    %4 = vector.broadcast %cst_2 : f32 to vector<1x1x256xf32>
    %5 = arith.maximumf %3, %4 : vector<1x1x256xf32>
    %6 = math.rsqrt %5 : vector<1x1x256xf32>
    %7 = vector.broadcast %6 : vector<1x1x256xf32> to vector<1x4x256xf32>
    %8 = arith.mulf %0, %7 : vector<1x4x256xf32>
    %c0_3 = arith.constant 0 : index
    %c0_4 = arith.constant 0 : index
    %c0_5 = arith.constant 0 : index
    %9 = vector.load %arg3[%c0_3, %c0_4, %c0_5] : memref<1x4x256xf32, #tpu.memory_space<vmem>>, vector<1x4x256xf32>
    tpu.vector_store %arg3[%c0_3, %c0_4, %c0_5], %8 {strides = array<i32>} : memref<1x4x256xf32, #tpu.memory_space<vmem>>, vector<1x4x256xf32>,
    return
  }
  func.func @transform_0(%arg0: i32, %arg1: i32) -> (i32, i32, i32) {
    %c0_i32 = arith.constant 0 : i32
    %c0_i32_0 = arith.constant 0 : i32
    return %arg0, %c0_i32, %arg1 : i32, i32, i32
  }
  func.func @transform_1(%arg0: i32, %arg1: i32) -> (i32, i32, i32) {
    %c0_i32 = arith.constant 0 : i32
    %c0_i32_0 = arith.constant 0 : i32
    return %arg0, %c0_i32, %arg1 : i32, i32, i32
  }
}

</mosaic_0001>

<bundles_post_ra>
// kernel: tpu_custom_call.1
= control target key start
LH: loop header
LB: loop body
LE: loop exit
PB: predicated region body
PF: predicated region fallthrough
CT: control target
= control target key end

     0   :  { %6 = vsyncpa [#allocation3], 0  ;;  %s665_s0 = inlined_call_operand.hbm [shape: f32[2,4,256], index: 0, kind: input, shape index: {}]   ;;  %s666_s1 = inlined_call_operand.hbm [shape: f32[2,4,256], index: 1, kind: output, shape index: {}]  }
   0x1   :  { %8 = vsyncpa [#allocation3 + $0x1], 0 }
   0x2   :  { %9 = vsyncpa [#allocation4], 0 }
   0x3   :  { %11 = vsyncpa [#allocation4 + $0x1], 0  ;;  %s493_s6 = smov 0   ;;  %s495_s7 = smov 0  }
   0x4   :  { %s497_s8 = smov 0   ;;  %s499_s9 = smov 0  }
   0x5   :  { %s501_s10 = smov 0   ;;  %s503_s11 = smov 0  }
   0x6 LB: > { %s284_s12 = sadd.s32 4294967295, %s479_s11   ;;  %s285_s13 = sadd.s32 4294967294, %s479_s11   ;;  %s479_s11 = sphi %s503_s11, %s17_s11   ;;  %s475_s10 = sphi %s501_s10, %s682_s10   ;;  %s471_s9 = sphi %s499_s9, %s681_s9   ;;  %s467_s8 = sphi %s497_s8, %s680_s8   ;;  %s463_s7 = sphi %s495_s7, %s679_s7   ;;  %s459_s6 = sphi %s493_s6, %s678_s6  }
   0x7   : > { %s29_s14 = sadd.s32 1, %s475_s10  ;;  %s38_s15 = sadd.s32 1, %s467_s8 }
   0x8   : > { %p31_p0 = scmp.ge.s32.totalorder %s29_s14, 2  ;;  %p45_p1 = scmp.ne.s32.totalorder %s467_s8, %s463_s7 }
   0x9   : > { %p46_p2 = scmp.eq.s32.totalorder %s479_s11, 0  ;;  %p51_p3 = scmp.ne.s32.totalorder %s463_s7, %s459_s6 }
   0xa   : > { %s684_s14 = smov (%p31_p0, %s29_s14), 0  ;;  %p52_p5 = scmp.eq.s32.totalorder %s284_s12, 0 }
   0xb   : > { %p534_p4 = por %p46_p2, %p45_p1  ;;  %s33_s17 = ssub.s32 %s475_s10, %s684_s14 }
   0xc   : > { %p77_p6 = scmp.eq.s32.totalorder %s284_s12, 1  ;;  %p36_p7 = scmp.eq.s32.totalorder %s33_s17, 0 }
   0xd   : > { %p540_p8 = por %p52_p5, %p51_p3  ;;  %p83_p10 = scmp.eq.s32.totalorder %s285_s13, 1 }
   0xe   : > { %p544_p9 = por %p77_p6, %p45_p1  ;;  %p313_p13 = scmp.lt.s32.totalorder %s479_s11, 2 }
   0xf   : > { %s549_s20 = scalar_select %p36_p7, %s467_s8, %s38_s15  }
  0x10   : > { %s670_s19 = scalar_select %p544_p9, 1, 0 }
  0x11   : > { %p551_p11 = por %p83_p10, %p51_p3  ;;  %s103_s22 = sand.u32 1, %s467_s8  }
  0x12   : > { %s288_s23 = sshll.u32 %s103_s22, 3  ;;  %s299_s24 = sshll.u32 %s475_s10, 7 }
  0x13   : > { %s671_s21 = scalar_select %p551_p11, 1, 0 }
  0x14   : > { %s562_s27 = scalar_lea.hbm %s665_s0, %s299_s24  ;;  %s107_s28 = scalar_lea.vmem [#allocation2], %s288_s23 }
  0x15   : > { %s117_s29 = sshll.u32 %s107_s28, 4  ;;  %p568_p0 = pnand %p313_p13, %p534_p4  ;;  %s564_s29 = int_to_ptr.vmem [resolvable:$true] %s117_s29 }
  0x16   : > { %s104_s2 = scalar_lea.sflag [#allocation3], %s103_s22  ;;  %s367_s3 = scalar_lea.hbm %s562_s27, 128 }
  0x17   : > { %p368_p3 = scmp.ne.s32.totalorder %s562_s27, %s367_s3  ;;  %p369_p5 = pneg %p568_p0 }
  0x18   : > { %s372_s12 = scalar_lea.hbm %s665_s0, 256  ;;  %p373_p4 = scmp.lt.u32.totalorder %s562_s27, %s665_s0 }
  0x19   : > { %p370_p6 = pnand %p369_p5, %p368_p3  ;;  %p374_p10 = scmp.lt.u32.totalorder %s372_s12, %s367_s3 }
  0x1a   : > { %p376_p12 = scmp.lt.u32.totalorder %s367_s3, %s562_s27 }
  0x1b   : > { %p371_p7 = pneg %p370_p6  ;;  %p375_p13 = por %p374_p10, %p373_p4 }
  0x1d   : > { %p377_p1 = por %p376_p12, %p375_p13 }
  0x1f   : > { %p378_p2 = pnand %p377_p1, %p371_p7 }
  0x21   : > { %381 = shalt.err (!%p378_p2)
}
  0x22   : > { %s382_s16 = scalar_lea.vmem %s564_s29, 128  ;;  %s481_s17 = smov [#allocation2]  }
  0x23   : > { %p383_p3 = scmp.ne.s32.totalorder %s564_s29, %s382_s16  ;;  %s387_s22 = sshll.u32 %s481_s17, 4  ;;  %s388_s22 = int_to_ptr.vmem [resolvable:$false] %s387_s22 }
  0x24   : > { %s389_s23 = scalar_lea.vmem %s388_s22, 256  ;;  %p390_p9 = scmp.lt.s32.totalorder %s564_s29, %s388_s22 }
  0x25   : > { %p385_p6 = pnand %p383_p3, %p369_p5  ;;  %p391_p4 = scmp.lt.s32.totalorder %s389_s23, %s382_s16 }
  0x27   : > { %p386_p11 = pneg %p385_p6  ;;  %p392_p10 = por %p391_p4, %p390_p9 }
  0x29   : > { %p393_p12 = pnand %p392_p10, %p386_p11 }
  0x2b   : > { %396 = shalt.err (!%p393_p12)
}
  0x2c   : > { %308 = dma.hbm_to_vmem [thread:$0]  (!%p568_p0), %s562_s27, 128, %s564_s29, %s104_s2  }
  0x2d   : > { %p673_p1 = scmp.lt.s32.totalorder %s479_s11, 3  ;;  %p674_p2 = scmp.ge.s32.totalorder %s479_s11, 1 }
  0x2f   : > { %p123_p5 = pnand %p674_p2, %p673_p1 }
  0x30   : > { %s604_s24 = sand.u32 (!%p123_p5), 1, %s463_s7  }
  0x31   : > { %126 = sbr.rel (%p123_p5) target bundleno = 106 (0x6a), region = 24  ;;  %s292_s25 = sshll.u32 (!%p123_p5), %s604_s24, 3 }
  0x32   : > { %s129_s26 = scalar_lea.sflag (!%p123_p5), [#allocation3], %s604_s24  ;;  %s132_s28 = scalar_lea.vmem (!%p123_p5), [#allocation2], %s292_s25 }
  0x38   : > { %450 = dma.done.wait (%p540_p8), %s129_s26, 128  }
  0x39   : > { %452 = vsyncadd (%p540_p8), %s129_s26, 4294967168  ;;  %v153_v0 = vld [vmem:[%s132_s28] sm:$0xff]  ;;  %vm158_vm0 = vcmask 1043456   ;;  %s150_s18 = scalar_lea.vmem [#allocation5], %s292_s25  ;;  %s300_s29 = sshll.u32 %s471_s9, 7 }
  0x3a   : > { %v154_v1 = vmul.f32 %v153_v0, %v153_v0  ;;  %s200_s27 = sshll.u32 %s150_s18, 4  ;;  %s618_s3 = scalar_lea.hbm %s666_s1, %s300_s29  ;;  %s613_s27 = int_to_ptr.vmem [resolvable:$true] %s200_s27 }
  0x3b   : > { %s184_s4 = scalar_lea.sflag [#allocation4], %s604_s24  ;;  %s397_s5 = scalar_lea.vmem %s613_s27, 128 }
  0x3c   : > { %v156_v2 = vcombine.high %v154_v1, %v154_v1  ;;  %v159_v3 = vsel %vm158_vm0, %v154_v1, 0.0  ;;  %p398_p8 = scmp.ne.s32.totalorder %s613_s27, %s397_s5  ;;  %p675_p9 = scmp.ne.s32.totalorder %s670_s19, 0 }
  0x3d   : > { %v160_v4 = vrot.slane %v159_v3, 4  ;;  %s482_s9 = smov [#allocation5]  }
  0x3e   : > { %v166_v5 = vsel %vm158_vm0, %v156_v2, 0.0  ;;  %p399_p11 = pnand %p398_p8, %p675_p9  ;;  %s401_s12 = sshll.u32 %s482_s9, 4  ;;  %s402_s12 = int_to_ptr.vmem [resolvable:$false] %s401_s12 }
  0x3f   : > { %v161_v6 = vadd.f32 %v160_v4, %v159_v3  ;;  %v167_v7 = vrot.slane %v166_v5, 4  ;;  %s403_s13 = scalar_lea.vmem %s402_s12, 256  ;;  %p404_p7 = scmp.lt.s32.totalorder %s613_s27, %s402_s12 }
  0x40   : > { %p400_p0 = pneg %p399_p11  ;;  %p405_p13 = scmp.lt.s32.totalorder %s403_s13, %s397_s5 }
  0x41   : > { %v162_v8 = vrot.slane %v161_v6, 2  ;;  %v168_v9 = vadd.f32 %v167_v7, %v166_v5 }
  0x42   : > { %p406_p3 = por %p405_p13, %p404_p7 }
  0x43   : > { %v163_v10 = vadd.f32 %v162_v8, %v161_v6  ;;  %v169_v11 = vrot.slane %v168_v9, 2 }
  0x44   : > { %p407_p6 = pnand %p406_p3, %p400_p0 }
  0x45   : > { %v164_v12 = vrot.slane %v163_v10, 1  ;;  %v170_v13 = vadd.f32 %v169_v11, %v168_v9 }
  0x47   : > { %v165_v14 = vadd.f32 %v164_v12, %v163_v10  ;;  %v171_v15 = vrot.slane %v170_v13, 1 }
  0x49   : > { %v172_v16 = vadd.f32 %v171_v15, %v170_v13  ;;  %v173_v17 = vmax.f32 %v165_v14, 1e-24 }
  0x4b   : > { %v174_v18 = vmax.f32 %v172_v16, 1e-24  ;;  %363 = vrsqrt.f32 %v173_v17 }
  0x4d   : > { %365 = vrsqrt.f32 %v174_v18 }
  0x55   : > { %v364_v19 = vpop.eup %363 }
  0x57   : > { %v366_v20 = vpop.eup %365 }
  0x58   : > { %v179_v21 = vcombine.low %v364_v19, %v366_v20 }
  0x5a   : > { %v181_v22 = vmul.f32 %v179_v21, %v153_v0 }
  0x5c   : > { %182 = vst [vmem:[%s150_s18] sm:$0xff] %v181_v22 }
  0x5d   : > { %410 = shalt.err (!%p407_p6)
}
  0x5e   : > { %s411_s15 = scalar_lea.hbm %s618_s3, 128  ;;  %s415_s22 = scalar_lea.hbm %s666_s1, 256 }
  0x5f   : > { %p412_p4 = scmp.ne.s32.totalorder %s618_s3, %s411_s15  ;;  %p416_p1 = scmp.lt.u32.totalorder %s618_s3, %s666_s1 }
  0x60   : > { %p417_p2 = scmp.lt.u32.totalorder %s415_s22, %s411_s15  ;;  %p419_p8 = scmp.lt.u32.totalorder %s411_s15, %s618_s3 }
  0x61   : > { %p413_p10 = pnand %p412_p4, %p675_p9 }
  0x62   : > { %p418_p5 = por %p417_p2, %p416_p1 }
  0x63   : > { %p414_p12 = pneg %p413_p10 }
  0x64   : > { %p420_p11 = por %p419_p8, %p418_p5 }
  0x66   : > { %p421_p0 = pnand %p420_p11, %p414_p12 }
  0x68   : > { %424 = shalt.err (!%p421_p0)
}
  0x69   : > { %303 = dma.vmem_to_hbm [thread:$0]  (%p675_p9), %s613_s27, 128, %s618_s3, %s184_s4  }
  0x6a PF: > { %s212_s25 = sand.u32 1, %s459_s6   ;;  %p676_p7 = scmp.ne.s32.totalorder %s671_s21, 0 }
  0x6b   : > { %p677_p13 = scmp.ge.s32.totalorder %s479_s11, 2  ;;  %s213_s26 = scalar_lea.sflag [#allocation4], %s212_s25 }
  0x6d   : > { %p310_p3 = pnand %p677_p13, %p676_p7 }
  0x6f   : > { %454 = dma.done.wait (!%p310_p3), %s213_s26, 128  }
  0x70   : > { %456 = vsyncadd (!%p310_p3), %s213_s26, 4294967168  ;;  %s17_s11 = sadd.s32 1, %s479_s11   ;;  %s678_s6 = smov %s463_s7 }
  0x71   : > { %p14_p6 = scmp.ge.s32.totalorder %s17_s11, 4   ;;  %s679_s7 = smov %s467_s8 }
  0x72   : > { %s680_s8 = smov %s549_s20  ;;  %s681_s9 = smov %s475_s10 }
  0x73   : > { %s682_s10 = smov %s684_s14  ;;  %16 = sbr.rel (!%p14_p6) target bundleno = 6 (0x6), region = 69 }
  0x7a   :  { %218 = vsyncpa [#allocation3], 1 }
  0x7b   :  { %220 = vsyncpa [#allocation3 + $0x1], 1 }
  0x7c   :  { %221 = vsyncpa [#allocation4], 1 }
  0x7d   :  { %223 = vsyncpa [#allocation4 + $0x1], 1 }

</bundles_post_ra>
